<compile_context>
chip_gen: v7x
topology: tpu7x:2x2x1
jax: 0.10.0
libtpu: 0.0.40
codegen_flags: <defaults>
</compile_context>

<pallas_src>
from functools import partial

import jax
import jax.numpy as jnp
from jax.experimental import pallas as pl
from jax.experimental.pallas import tpu as pltpu
from jax.scipy.linalg import block_diag as jblock_diag

LEAKY_SLOPE = 0.2


def _leaky(x, slope=LEAKY_SLOPE):
    # torch.nn.LeakyReLU(0.2): one VPU max instead of cmp+select.
    return jnp.maximum(x, slope * x)


def _round_up(n, m):
    return ((n + m - 1) // m) * m


# ----------------------------------------------------------------------------
# Pallas kernel: entire ConstEncoderFromSpec chain, fused, at row-count 1.
#   rows_ref    : (2 + 2*n_blocks, W) f32  = [const, b0_0, b1_0, ..., bo]
#   weights_ref : (3*W*n_blocks + W, W) bf16
#                 per block: [w0^T (W rows) ; fused [wsc^T ; w1^T] (2W rows)]
#                 then the output-layer weight (W rows)
# ----------------------------------------------------------------------------
def _make_const_kernel(n_blocks, W):
    bf16 = jnp.bfloat16

    def kernel(rows_ref, w_ref, out_ref):
        x = rows_ref[0:1, :]                                  # (1, W) f32
        for i in range(n_blocks):                             # unrolled at trace time
            base = 3 * W * i
            w0 = w_ref[base:base + W, :]                      # (W, W)   bf16
            fr = w_ref[base + W:base + 3 * W, :]              # (2W, W)  bf16 [wsc^T;w1^T]
            b0 = rows_ref[1 + 2 * i:2 + 2 * i, :]             # (1, W)   f32
            b1 = rows_ref[2 + 2 * i:3 + 2 * i, :]             # (1, W)   f32
            net = jnp.dot(_leaky(x).astype(bf16), w0,
                          preferred_element_type=jnp.float32) + b0
            # Fused shortcut + second conv: [x, leaky(net)] @ [wsc^T ; w1^T] + b1
            lhs = jnp.concatenate(
                [x.astype(bf16), _leaky(net).astype(bf16)], axis=1)   # (1, 2W)
            x = jnp.dot(lhs, fr, preferred_element_type=jnp.float32) + b1
        wo = w_ref[3 * W * n_blocks:3 * W * n_blocks + W, :]
        bo = rows_ref[1 + 2 * n_blocks:2 + 2 * n_blocks, :]
        # self.act layer + act() inside the last-layer branch: leaky(leaky(x)).
        a = jnp.maximum(x, (LEAKY_SLOPE * LEAKY_SLOPE) * x)
        out_ref[...] = jnp.dot(a.astype(bf16), wo,
                               preferred_element_type=jnp.float32) + bo

    return kernel


@partial(jax.jit, static_argnums=(2, 3, 4, 5, 6))
def _const_encoder_forward(rows_pack, weights_pack, n_blocks, W,
                           batch, groups, out_dim):
    y = pl.pallas_call(
        _make_const_kernel(n_blocks, W),
        # Single invocation (no grid): both packed arrays land in VMEM with one
        # DMA each — no pipeline prologue/epilogue, no double buffering.
        in_specs=[pl.BlockSpec(memory_space=pltpu.MemorySpace.VMEM),
                  pl.BlockSpec(memory_space=pltpu.MemorySpace.VMEM)],
        out_specs=pl.BlockSpec(memory_space=pltpu.MemorySpace.VMEM),
        out_shape=jax.ShapeDtypeStruct((1, W), jnp.float32),   # lane-dense output
    )(rows_pack, weights_pack)
    row = y[:, :groups * out_dim].reshape(1, groups, out_dim)
    # Batch-invariant: broadcast the single computed row to the batch.
    return jnp.broadcast_to(row, (batch, groups, out_dim))


def forward_pallas(x, rows_pack, weights_pack, n_blocks, W, spec):
    """ConstEncoderFromSpec.forward — `x` contributes only its batch size."""
    return _const_encoder_forward(rows_pack, weights_pack, n_blocks, W,
                                  x.shape[0], spec["groups"], spec["out_dim"])


# ----------------------------------------------------------------------------
# Parameters: synthetic init + one-time conversion to kernel-ready layout.
# ----------------------------------------------------------------------------
def init_params(key, hidden_size, spec):
    groups, out_dim = spec["groups"], spec["out_dim"]
    chd = int(hidden_size / groups)
    key, kc = jax.random.split(key)
    params = {"const": jax.random.normal(kc, (1, chd * groups), jnp.float32),
              "blocks": []}
    idx = 0
    while True:
        size_out = int(chd / 2 ** (idx + 1))
        if size_out <= out_dim * 2:
            break
        size_in = int(chd / 2 ** idx)
        size_h = size_in
        key, ka, kb, kc2, kd, ke = jax.random.split(key, 6)
        params["blocks"].append(dict(
            w0=0.1 * jax.random.normal(ka, (groups, size_h, size_in), jnp.float32),
            b0=0.1 * jax.random.normal(kb, (groups * size_h,), jnp.float32),
            w1=0.1 * jax.random.normal(kc2, (groups, size_out, size_h), jnp.float32),
            b1=0.1 * jax.random.normal(kd, (groups * size_out,), jnp.float32),
            wsc=0.1 * jax.random.normal(ke, (groups, size_out, size_in), jnp.float32),
        ))
        idx += 1
    final_in = int(chd / 2 ** idx)
    key, ko, kob = jax.random.split(key, 3)
    # output_layer_init_method is init-only; default (False) == random init.
    params["wo"] = 0.1 * jax.random.normal(ko, (groups, out_dim, final_in), jnp.float32)
    params["bo"] = 0.1 * jax.random.normal(kob, (groups * out_dim,), jnp.float32)
    return params


def prepare_params(params, spec):
    """One-time conversion to the kernel-ready layout:
    - every channel dim zero-padded to a common 128-lane-multiple width W,
    - grouped-conv weights densified block-diagonally, transposed for
      row-vector matmuls, shortcut fused with the second conv as extra K rows,
      ALL stacked into one contiguous bf16 buffer,
    - learned constant + biases stacked into one contiguous f32 buffer.
    Returns ((rows_pack_f32, weights_pack_bf16), W)."""
    groups = spec["groups"]
    chd = params["const"].shape[1] // groups
    W = max(128, _round_up(groups * chd, 128))

    def pad_row(v):
        return jnp.zeros((1, W), jnp.float32).at[0, :v.shape[-1]].set(
            v.reshape(-1).astype(jnp.float32))

    rows = [pad_row(params["const"])]
    wblocks = []
    for blk in params["blocks"]:
        g, size_h, size_in = blk["w0"].shape
        _, size_out, _ = blk["w1"].shape
        cin, h, cout = g * size_in, g * size_h, g * size_out
        w0t = jnp.zeros((W, W), jnp.float32).at[:cin, :h].set(
            jblock_diag(*blk["w0"]).T)
        fused = jnp.zeros((2 * W, W), jnp.float32)
        fused = fused.at[:cin, :cout].set(jblock_diag(*blk["wsc"]).T)       # shortcut
        fused = fused.at[W:W + h, :cout].set(jblock_diag(*blk["w1"]).T)     # conv 1
        wblocks += [w0t, fused]
        rows += [pad_row(blk["b0"]), pad_row(blk["b1"])]
    g, od, fin = params["wo"].shape
    wot = jnp.zeros((W, W), jnp.float32).at[:g * fin, :g * od].set(
        jblock_diag(*params["wo"]).T)
    wblocks.append(wot)
    rows.append(pad_row(params["bo"]))

    rows_pack = jnp.concatenate(rows, axis=0)                         # f32
    weights_pack = jnp.concatenate(wblocks, axis=0).astype(jnp.bfloat16)
    jax.block_until_ready((rows_pack, weights_pack))
    return (rows_pack, weights_pack), W


# ----------------------------------------------------------------------------
# Pure-JAX f32 reference (verification only)
# ----------------------------------------------------------------------------
def forward_ref(params, x, spec):
    B = x.shape[0]
    G, D = spec["groups"], spec["out_dim"]

    def gconv(h, w, b):  # grouped 1x1 conv on (B, G*Ci) with w (G, Co, Ci)
        g, co, ci = w.shape
        y = jnp.einsum("bgi,goi->bgo", h.reshape(h.shape[0], g, ci), w)
        y = y.reshape(h.shape[0], g * co)
        return y if b is None else y + b

    def leaky(v):
        return jnp.where(v >= 0, v, LEAKY_SLOPE * v)

    h = jnp.broadcast_to(params["const"], (B, params["const"].shape[1]))
    for blk in params["blocks"]:
        net = gconv(leaky(h), blk["w0"], blk["b0"])
        dx = gconv(leaky(net), blk["w1"], blk["b1"])
        hs = gconv(h, blk["wsc"], None)
        h = hs + dx
    y = gconv(leaky(leaky(h)), params["wo"], params["bo"])
    return y.reshape(B, G, D)


if __name__ == "__main__":
    B, hidden_size = 2, 64
    spec = {"out_dim": 3, "groups": 4}

    key = jax.random.PRNGKey(0)
    key, kx = jax.random.split(key)
    # The module only reads x.size(0); give it a plausible (B, hidden) tensor.
    x = jax.random.normal(kx, (B, hidden_size), jnp.float32)

    params = init_params(key, hidden_size, spec)
    (rows_pack, weights_pack), W = prepare_params(params, spec)   # built once
    n_blocks = len(params["blocks"])

    out = forward_pallas(x, rows_pack, weights_pack, n_blocks, W, spec)
    out = jax.block_until_ready(out)

    ref = forward_ref(params, x, spec)
    assert out.shape == (B, spec["groups"], spec["out_dim"])
    # bf16 weights / bf16 dot operands with f32 accumulation -> looser tolerance.
    assert jnp.allclose(out, ref, rtol=2e-2, atol=2e-2), \
        float(jnp.max(jnp.abs(out - ref)))

    print("KERNEL_OK")
</pallas_src>

<mosaic_0001>
module attributes {stable_mosaic.version = 11 : i64} {
  func.func @kernel(%arg0: memref<4x128xf32, #tpu.memory_space<vmem>>, %arg1: memref<512x128xbf16, #tpu.memory_space<vmem>>, %arg2: memref<1x128xf32, #tpu.memory_space<vmem>>) attributes {dimension_semantics = [], scalar_prefetch = 0 : i64, scratch_operands = 0 : i64, tpu.core_type = #tpu.core_type<tc>} {
    %c0 = arith.constant 0 : index
    %c0_0 = arith.constant 0 : index
    %0 = vector.load %arg0[%c0, %c0_0] : memref<4x128xf32, #tpu.memory_space<vmem>>, vector<1x128xf32>
    %c0_1 = arith.constant 0 : index
    %c0_2 = arith.constant 0 : index
    %1 = vector.load %arg1[%c0_1, %c0_2] : memref<512x128xbf16, #tpu.memory_space<vmem>>, vector<128x128xbf16>
    %c128 = arith.constant 128 : index
    %c0_3 = arith.constant 0 : index
    %2 = vector.load %arg1[%c128, %c0_3] : memref<512x128xbf16, #tpu.memory_space<vmem>>, vector<256x128xbf16>
    %c1 = arith.constant 1 : index
    %c0_4 = arith.constant 0 : index
    %3 = vector.load %arg0[%c1, %c0_4] : memref<4x128xf32, #tpu.memory_space<vmem>>, vector<1x128xf32>
    %c2 = arith.constant 2 : index
    %c0_5 = arith.constant 0 : index
    %4 = vector.load %arg0[%c2, %c0_5] : memref<4x128xf32, #tpu.memory_space<vmem>>, vector<1x128xf32>
    %cst = arith.constant 2.000000e-01 : f32
    %5 = vector.broadcast %cst : f32 to vector<1x128xf32>
    %6 = arith.mulf %5, %0 : vector<1x128xf32>
    %7 = arith.maximumf %0, %6 : vector<1x128xf32>
    %8 = arith.truncf %7 : vector<1x128xf32> to vector<1x128xbf16>
    %cst_6 = arith.constant dense<0.000000e+00> : vector<1x128xf32>
    %9 = tpu.matmul %8, %1, %cst_6 {dimension_numbers = #tpu.dot_dimension_numbers<[1], [0], [0], [1], [0, 0, 1, 1], [], []>} : vector<1x128xbf16>, vector<128x128xbf16>, vector<1x128xf32> -> vector<1x128xf32>
    %10 = arith.addf %9, %3 : vector<1x128xf32>
    %11 = arith.truncf %0 : vector<1x128xf32> to vector<1x128xbf16>
    %cst_7 = arith.constant 2.000000e-01 : f32
    %12 = vector.broadcast %cst_7 : f32 to vector<1x128xf32>
    %13 = arith.mulf %12, %10 : vector<1x128xf32>
    %14 = arith.maximumf %10, %13 : vector<1x128xf32>
    %15 = arith.truncf %14 : vector<1x128xf32> to vector<1x128xbf16>
    %16 = tpu.concatenate %11, %15 in 1 : vector<1x128xbf16>, vector<1x128xbf16> -> vector<1x256xbf16>
    %cst_8 = arith.constant dense<0.000000e+00> : vector<1x128xf32>
    %17 = tpu.matmul %16, %2, %cst_8 {dimension_numbers = #tpu.dot_dimension_numbers<[1], [0], [0], [1], [0, 0, 1, 1], [], []>} : vector<1x256xbf16>, vector<256x128xbf16>, vector<1x128xf32> -> vector<1x128xf32>
    %18 = arith.addf %17, %4 : vector<1x128xf32>
    %c384 = arith.constant 384 : index
    %c0_9 = arith.constant 0 : index
    %19 = vector.load %arg1[%c384, %c0_9] : memref<512x128xbf16, #tpu.memory_space<vmem>>, vector<128x128xbf16>
    %c3 = arith.constant 3 : index
    %c0_10 = arith.constant 0 : index
    %20 = vector.load %arg0[%c3, %c0_10] : memref<4x128xf32, #tpu.memory_space<vmem>>, vector<1x128xf32>
    %cst_11 = arith.constant 4.000000e-02 : f32
    %21 = vector.broadcast %cst_11 : f32 to vector<1x128xf32>
    %22 = arith.mulf %21, %18 : vector<1x128xf32>
    %23 = arith.maximumf %18, %22 : vector<1x128xf32>
    %24 = arith.truncf %23 : vector<1x128xf32> to vector<1x128xbf16>
    %cst_12 = arith.constant dense<0.000000e+00> : vector<1x128xf32>
    %25 = tpu.matmul %24, %19, %cst_12 {dimension_numbers = #tpu.dot_dimension_numbers<[1], [0], [0], [1], [0, 0, 1, 1], [], []>} : vector<1x128xbf16>, vector<128x128xbf16>, vector<1x128xf32> -> vector<1x128xf32>
    %26 = arith.addf %25, %20 : vector<1x128xf32>
    %c0_13 = arith.constant 0 : index
    %c0_14 = arith.constant 0 : index
    %27 = vector.load %arg2[%c0_13, %c0_14] : memref<1x128xf32, #tpu.memory_space<vmem>>, vector<1x128xf32>
    tpu.vector_store %arg2[%c0_13, %c0_14], %26 {strides = array<i32>} : memref<1x128xf32, #tpu.memory_space<vmem>>, vector<1x128xf32>,
    return
  }
}

</mosaic_0001>

<bundles_post_ra>
// kernel: _const_encoder_forward.1
= control target key start
LH: loop header
LB: loop body
LE: loop exit
PB: predicated region body
PF: predicated region fallthrough
CT: control target
= control target key end

     0   :  { %7 = vsyncpa [#allocation3], 0  ;;  %s714_s0 = inlined_call_operand.hbm [shape: f32[4,128], index: 0, kind: input, shape index: {}]   ;;  %s715_s1 = inlined_call_operand.hbm [shape: bf16[512,128], index: 1, kind: input, shape index: {}]   ;;  %s716_s2 = inlined_call_operand.vmem [shape: f32[1,128], index: 2, kind: output, shape index: {}]  }
   0x1   :  { %8 = vsyncpa [#allocation5], 0  ;;  %s633_s9 = smov [#allocation2]   ;;  %s634_s11 = smov [#allocation4]  }
   0x2   :  { %s15_s10 = sshll.u32 %s633_s9, 4  ;;  %s24_s12 = sshll.u32 %s634_s11, 4  ;;  %s16_s10 = int_to_ptr.vmem [resolvable:$true] %s15_s10  ;;  %s654_s12 = int_to_ptr.vmem [resolvable:$true] %s24_s12 }
   0x3   :  { %s585_s15 = scalar_lea.hbm %s714_s0, 64 }
   0x4   :  { %p586_p0 = scmp.ne.s32.totalorder %s714_s0, %s585_s15  ;;  %p589_p1 = scmp.lt.u32.totalorder %s585_s15, %s714_s0 }
   0x6   :  { %p591_p2 = pnand %p589_p1, %p586_p0 }
   0x8   :  { %594 = shalt.err (!%p591_p2)
}
   0x9   :  { %s595_s20 = scalar_lea.vmem %s16_s10, 64  ;;  %p600_p4 = scmp.lt.s32.totalorder %s16_s10, %s16_s10 }
   0xa   :  { %p596_p3 = scmp.ne.s32.totalorder %s16_s10, %s595_s20  ;;  %p601_p5 = scmp.lt.s32.totalorder %s595_s20, %s595_s20 }
   0xc   :  { %p602_p6 = por %p601_p5, %p600_p4 }
   0xe   :  { %p603_p7 = pnand %p602_p6, %p596_p3 }
  0x10   :  { %606 = shalt.err (!%p603_p7)
}
  0x11   :  { %18 = dma.hbm_to_vmem [thread:$0]  %s714_s0, 64, %s16_s10, [#allocation3]  }
  0x12   :  { %s607_s25 = scalar_lea.hbm %s715_s1, 4096 }
  0x13   :  { %p608_p8 = scmp.ne.s32.totalorder %s715_s1, %s607_s25  ;;  %p611_p9 = scmp.lt.u32.totalorder %s607_s25, %s715_s1 }
  0x15   :  { %p613_p10 = pnand %p611_p9, %p608_p8 }
  0x17   :  { %616 = shalt.err (!%p613_p10)
}
  0x18   :  { %s617_s30 = scalar_lea.vmem %s654_s12, 4096  ;;  %p622_p12 = scmp.lt.s32.totalorder %s654_s12, %s654_s12 }
  0x19   :  { %p618_p11 = scmp.ne.s32.totalorder %s654_s12, %s617_s30  ;;  %p623_p13 = scmp.lt.s32.totalorder %s617_s30, %s617_s30 }
  0x1b   :  { %p624_p0 = por %p623_p13, %p622_p12 }
  0x1d   :  { %p625_p1 = pnand %p624_p0, %p618_p11 }
  0x1f   :  { %628 = shalt.err (!%p625_p1)
}
  0x20   :  { %s635_s0 = smov 64   ;;  %s636_s3 = smov 4  }
  0x21   :  { %30 = dma.hbm_to_vmem [thread:$0]  %s715_s1, 4096, %s654_s12, [#allocation5], %s635_s0, %s635_s0, %s636_s3  }
  0x22   :  { %629 = dma.done.wait [#allocation3], 64  }
  0x23   :  { %630 = vsyncadd [#allocation3], 4294967232 }
  0x24   :  { %631 = dma.done.wait [#allocation5], 4096  }
  0x25   :  { %632 = vsyncadd [#allocation5], 4294963200  ;;  %v637_v0 = vmov 0.0   ;;  %vm638_vm0 = vmmov 0   ;;  %v553_v1 = vld [vmem:[#allocation4] sm:$0xff]   ;;  %v554_v2 = vld [vmem:[#allocation4 + $0x8] sm:$0xff]  }
  0x26   :  { %507 = vmatprep.subr.bf16.mxu0 %v637_v0  ;;  %523 = vmatprep.mubr.msk.bf16.mxu0 %vm638_vm0, %v637_v0  ;;  %v555_v3 = vld [vmem:[#allocation4 + $0x10] sm:$0xff]   ;;  %v556_v4 = vld [vmem:[#allocation4 + $0x18] sm:$0xff]   ;;  %v561_v5 = vld [vmem:[#allocation4 + $0x80] sm:$0xff]  }
  0x27   :  { %508 = vmatpush3.bf16.msra.mxu0 %v553_v1  ;;  %v562_v6 = vld [vmem:[#allocation4 + $0x40] sm:$0xff]   ;;  %476 = vmatprep.subr.bf16.mxu1 %v561_v5  ;;  %v563_v7 = vld [vmem:[#allocation4 + $0x88] sm:$0xff]   ;;  %v565_v9 = vld [vmem:[#allocation4 + $0x90] sm:$0xff]  }
  0x28   :  { %509 = vmatprep.subr.bf16.mxu0 %v637_v0  ;;  %477 = vmatpush3.bf16.msra.mxu1 %v562_v6  ;;  %v564_v8 = vld [vmem:[#allocation4 + $0x48] sm:$0xff]   ;;  %v557_v10 = vld [vmem:[#allocation4 + $0x20] sm:$0xff]   ;;  %v692_v11 = vld [vmem:[#allocation2] sm:$0x1] }
  0x29   :  { %478 = vmatprep.subr.bf16.mxu1 %v563_v7  ;;  %v566_v12 = vld [vmem:[#allocation4 + $0x50] sm:$0xff]   ;;  %v567_v13 = vld [vmem:[#allocation4 + $0x98] sm:$0xff]   ;;  %v558_v14 = vld [vmem:[#allocation4 + $0x28] sm:$0xff]   ;;  %v89_v16 = vmul.f32 0.2, %v692_v11  ;;  %v180_v42 = vpack.c.bf16 %v692_v11, %v692_v11 }
  0x2a   :  { %v559_v15 = vld [vmem:[#allocation4 + $0x30] sm:$0xff]   ;;  %v568_v17 = vld [vmem:[#allocation4 + $0x58] sm:$0xff]   ;;  %v569_v18 = vld [vmem:[#allocation4 + $0xa0] sm:$0xff]  }
  0x2b   :  { %510 = vmatpush3.bf16.msra.mxu0 %v554_v2  ;;  %v570_v19 = vld [vmem:[#allocation4 + $0x60] sm:$0xff]   ;;  %v571_v20 = vld [vmem:[#allocation4 + $0xa8] sm:$0xff]   ;;  %v560_v21 = vld [vmem:[#allocation4 + $0x38] sm:$0xff]   ;;  %v90_v22 = vmax.f32 %v692_v11, %v89_v16 }
  0x2c   :  { %511 = vmatprep.subr.bf16.mxu0 %v637_v0  ;;  %479 = vmatpush3.bf16.msra.mxu1 %v564_v8  ;;  %v572_v23 = vld [vmem:[#allocation4 + $0x68] sm:$0xff]   ;;  %v573_v25 = vld [vmem:[#allocation4 + $0xb0] sm:$0xff]   ;;  %v575_v27 = vld [vmem:[#allocation4 + $0xb8] sm:$0xff]  }
  0x2d   :  { %480 = vmatprep.subr.bf16.mxu1 %v565_v9  ;;  %v91_v24 = vpack.c.bf16 %v90_v22, %v90_v22  ;;  %v574_v26 = vld [vmem:[#allocation4 + $0x70] sm:$0xff]   ;;  %v576_v28 = vld [vmem:[#allocation4 + $0x78] sm:$0xff]   ;;  %v577_v29 = vld [vmem:[#allocation4 + $0xc0] sm:$0xff]  }
  0x2e   :  { %v578_v30 = vld [vmem:[#allocation4 + $0xc8] sm:$0xff]   ;;  %v579_v31 = vld [vmem:[#allocation4 + $0xd0] sm:$0xff]   ;;  %v580_v32 = vld [vmem:[#allocation4 + $0xd8] sm:$0xff]  }
  0x2f   :  { %512 = vmatpush3.bf16.msra.mxu0 %v555_v3  ;;  %v581_v33 = vld [vmem:[#allocation4 + $0xe0] sm:$0xff]   ;;  %v87_v34 = vld [vmem:[#allocation2 + $0x1] sm:$0x1]  ;;  %v582_v44 = vld [vmem:[#allocation4 + $0xe8] sm:$0xff]  }
  0x30   :  { %513 = vmatprep.subr.bf16.mxu0 %v637_v0  ;;  %481 = vmatpush3.bf16.msra.mxu1 %v566_v12  ;;  %v583_v45 = vld [vmem:[#allocation4 + $0xf0] sm:$0xff]   ;;  %v584_v46 = vld [vmem:[#allocation4 + $0xf8] sm:$0xff]  }
  0x31   :  { %482 = vmatprep.subr.bf16.mxu1 %v567_v13  ;;  %v88_v48 = vld [vmem:[#allocation2 + $0x2] sm:$0x1]  ;;  %v336_v57 = vld [vmem:[#allocation2 + $0x3] sm:$0x1] }
  0x33   :  { %514 = vmatpush3.bf16.msra.mxu0 %v556_v4 }
  0x34   :  { %515 = vmatprep.subr.bf16.mxu0 %v637_v0  ;;  %483 = vmatpush3.bf16.msra.mxu1 %v568_v17 }
  0x35   :  { %484 = vmatprep.subr.bf16.mxu1 %v569_v18 }
  0x37   :  { %516 = vmatpush3.bf16.msra.mxu0 %v557_v10 }
  0x38   :  { %517 = vmatprep.subr.bf16.mxu0 %v637_v0  ;;  %485 = vmatpush3.bf16.msra.mxu1 %v570_v19 }
  0x39   :  { %486 = vmatprep.subr.bf16.mxu1 %v571_v20 }
  0x3b   :  { %518 = vmatpush3.bf16.msra.mxu0 %v558_v14 }
  0x3c   :  { %519 = vmatprep.subr.bf16.mxu0 %v637_v0  ;;  %487 = vmatpush3.bf16.msra.mxu1 %v572_v23 }
  0x3d   :  { %488 = vmatprep.subr.bf16.mxu1 %v573_v25 }
  0x3f   :  { %520 = vmatpush3.bf16.msra.mxu0 %v559_v15 }
  0x40   :  { %521 = vmatprep.subr.bf16.mxu0 %v637_v0  ;;  %489 = vmatpush3.bf16.msra.mxu1 %v574_v26 }
  0x41   :  { %490 = vmatprep.subr.bf16.mxu1 %v575_v27 }
  0x43   :  { %522 = vmatpush3.bf16.msra.mxu0 %v560_v21 }
  0x44   :  { %527 = vmatprep.subr.bf16.mxu0 %v637_v0  ;;  %491 = vmatpush3.bf16.msra.mxu1 %v576_v28 }
  0x46   :  { %524 = vmatmul.mubr.bf16.vlgmr.msra.gmra.mrb[0].mxu0 %v91_v24 }
  0x47   :  { %543 = vmatprep.mubr.msk.bf16.mxu0 %vm638_vm0, %v637_v0  ;;  %528 = vmatpush3.bf16.msra.mxu0 %v577_v29 }
  0x48   :  { %529 = vmatprep.subr.bf16.mxu0 %v637_v0 }
  0x4b   :  { %530 = vmatpush3.bf16.msra.mxu0 %v578_v30 }
  0x4c   :  { %531 = vmatprep.subr.bf16.mxu0 %v637_v0 }
  0x4f   :  { %532 = vmatpush3.bf16.msra.mxu0 %v579_v31 }
  0x50   :  { %533 = vmatprep.subr.bf16.mxu0 %v637_v0 }
  0x53   :  { %534 = vmatpush3.bf16.msra.mxu0 %v580_v32 }
  0x54   :  { %535 = vmatprep.subr.bf16.mxu0 %v637_v0 }
  0x57   :  { %536 = vmatpush3.bf16.msra.mxu0 %v581_v33 }
  0x58   :  { %537 = vmatprep.subr.bf16.mxu0 %v637_v0 }
  0x5b   :  { %538 = vmatpush3.bf16.msra.mxu0 %v582_v44 }
  0x5c   :  { %539 = vmatprep.subr.bf16.mxu0 %v637_v0 }
  0x5f   :  { %540 = vmatpush3.bf16.msra.mxu0 %v583_v45 }
  0x60   :  { %541 = vmatprep.subr.bf16.mxu0 %v637_v0 }
  0x63   :  { %542 = vmatpush3.bf16.msra.mxu0 %v584_v46 }
 0x119   :  { %v174_v35 = vpop.f32.mrb[0].mxu0 }
 0x11a   :  { %v175_v36 = vadd.f32 %v174_v35, %v87_v34  ;;  %v525_v37 = vpop.f32.mrb[1].mxu0 }
 0x11b   :  { %v177_v38 = vpop.f32.mrb[2].mxu0 }
 0x11c   :  { %v526_v39 = vpop.f32.mrb[3].mxu0  ;;  %v181_v40 = vmul.f32 0.2, %v175_v36 }
 0x11e   :  { %v182_v41 = vmax.f32 %v175_v36, %v181_v40 }
 0x120   :  { %v183_v43 = vpack.c.bf16 %v182_v41, %v182_v41 }
 0x122   :  { %312 = vmatprep.mubr.bf16.mxu1 %v183_v43 }
 0x123   :  { %313 = vmatmul.mubr.bf16.vlgmr.msra.gmra.mrb[0].mxu1 %v180_v42 }
 0x1f6   :  { %v492_v47 = vpop.f32.mrb[0].mxu1 }
 0x1f7   :  { %v493_v49 = vpop.f32.mrb[1].mxu1 }
 0x1f8   :  { %v494_v50 = vadd.f32 %v493_v49, %v492_v47  ;;  %v495_v51 = vpop.f32.mrb[2].mxu1 }
 0x1f9   :  { %v496_v52 = vpop.f32.mrb[3].mxu1 }
 0x1fa   :  { %v315_v53 = vadd.f32 %v494_v50, %v88_v48 }
 0x1fc   :  { %v337_v54 = vmul.f32 0.04, %v315_v53 }
 0x1fe   :  { %v338_v55 = vmax.f32 %v315_v53, %v337_v54 }
 0x200   :  { %v339_v56 = vpack.c.bf16 %v338_v55, %v338_v55 }
 0x202   :  { %544 = vmatmul.mubr.bf16.vlgmr.msra.gmra.mrb[4].mxu0 %v339_v56 }
 0x2d5   :  { %v422_v58 = vpop.f32.mrb[4].mxu0 }
 0x2d6   :  { %v423_v59 = vadd.f32 %v422_v58, %v336_v57  ;;  %v545_v60 = vpop.f32.mrb[5].mxu0 }
 0x2d7   :  { %v425_v61 = vpop.f32.mrb[6].mxu0 }
 0x2d8   :  { %428 = vst [vmem:[%s716_s2] sm:$0x1] %v423_v59  ;;  %v546_v62 = vpop.f32.mrb[7].mxu0 }
 0x2d9   :  { %433 = vsyncpa [#allocation3], 1 }
 0x2da   :  { %434 = vsyncpa [#allocation5], 1 }

</bundles_post_ra>
